<compile_context>
chip_gen: v5e
topology: v5e:2x2
jax: 0.10.0
libtpu: 0.0.40
codegen_flags: <defaults>
</compile_context>

<pallas_src>
import functools

import jax
import jax.numpy as jnp
from jax.experimental import pallas as pl
from jax.experimental.pallas import tpu as pltpu


def _vmem_budgets():
    """Generation-aware VMEM budgets (pred double-buffer budget, hard limit)."""
    cap = 64 << 20  # conservative (v7x-sized) fallback
    try:
        info = pltpu.get_tpu_info()
        cap = int(getattr(info, "vmem_capacity_bytes", cap)) or cap
    except Exception:
        pass
    tile_budget = cap // 2          # budget for the double-buffered pred tile
    limit_cap = (cap * 3) // 4      # headroom for compiler scratch / aux bufs
    return tile_budget, limit_cap


def _pick_class_tile(B, C, itemsize, tile_budget):
    """Class-dim tile: full C when a decent row slab fits, else a 128-multiple."""
    min_rows = max(8, min(B, 256))                  # rows we want resident for DMA efficiency
    if 2 * min_rows * C * itemsize <= tile_budget:
        return C
    if C % 128 != 0:
        return C                                    # can't tile cleanly; keep full C
    cap = max(128, tile_budget // (2 * min_rows * itemsize))
    tc = (min(cap, C) // 128) * 128
    while tc >= 128:
        if C % tc == 0:
            return tc
        tc -= 128
    return C


def _pick_batch_tile(B, tc, itemsize, tile_budget):
    """Largest aligned batch tile fitting VMEM, capped so large B gets >=8 steps."""
    align = 16 if itemsize < 4 else 8               # bf16 min sublane tile is 16
    per_row = max(1, tc * itemsize)
    cap = max(align, tile_budget // (2 * per_row))  # 2x for double buffering
    # Aim for >= ~8 grid steps (pipeline overlap + megacore) but keep tiles
    # >= ~2 MiB so per-step overhead stays amortized.
    min_rows = max(align, -(-(2 << 20) // per_row))
    cap = min(cap, max(min_rows, B // 8), 4096)
    if cap >= B:
        return B                                    # whole batch, one grid step
    tb = max(align, (cap // align) * align)
    while tb >= align:
        if B % tb == 0:
            return tb
        tb -= align
    for cand in range(min(cap, B), align - 1, -1):  # fallback: aligned divisor of B
        if B % cand == 0 and cand % align == 0:
            return cand
    return B


def _label_smoothing_kernel(pred_ref, tgt_ref, loss_ref, m_sc, d_sc, s_sc, *,
                            smoothing, confidence, classes, class_tile):
    # per step: pred chunk (tb, tc), target (tb, 1) int32 -> per-row loss (tb, 1)
    k = pl.program_id(1)

    @pl.when(k == 0)
    def _init():
        m_sc[...] = jnp.full_like(m_sc, -jnp.inf)
        d_sc[...] = jnp.zeros_like(d_sc)
        s_sc[...] = jnp.zeros_like(s_sc)

    p = pred_ref[...].astype(jnp.float32)          # (tb, tc)
    t = tgt_ref[...]                               # (tb, 1) int32

    # Online (numerically stable) log-sum-exp over the class chunks.
    m_prev = m_sc[...]
    m_new = jnp.maximum(m_prev, jnp.max(p, axis=-1, keepdims=True))
    d_sc[...] = d_sc[...] * jnp.exp(m_prev - m_new) + jnp.sum(
        jnp.exp(p - m_new), axis=-1, keepdims=True)
    m_sc[...] = m_new

    # Fused weighted reduction.  Weights: smooth_val everywhere, confidence at
    # the target column; they sum to exactly 1 over the full class dim, so
    #   loss_row = lse - sum_j w_j * p_j
    # The iota is (1, tc) and broadcasts against the (tb, 1) target.
    smooth_val = smoothing / (classes - 1)
    col = jax.lax.broadcasted_iota(jnp.int32, (1, p.shape[-1]), 1) + k * class_tile
    w = jnp.where(col == t, confidence, smooth_val)
    s_sc[...] = s_sc[...] + jnp.sum(p * w, axis=-1, keepdims=True)

    @pl.when(k == pl.num_programs(1) - 1)
    def _finalize():
        loss_ref[...] = m_sc[...] + jnp.log(d_sc[...]) - s_sc[...]


def label_smoothing_loss(pred, target, *, classes, smoothing=0.0, tb=None, tc=None):
    """Pallas equivalent of LabelSmoothingLoss(classes, smoothing).forward."""
    B, C = pred.shape
    assert C == classes
    assert classes > 1, "smoothing/(classes-1) requires classes > 1"
    confidence = 1.0 - smoothing

    itemsize = jnp.dtype(pred.dtype).itemsize
    tile_budget, limit_cap = _vmem_budgets()
    if tc is None:
        tc = _pick_class_tile(B, C, itemsize, tile_budget)
    if tb is None:
        tb = _pick_batch_tile(B, tc, itemsize, tile_budget)
    assert B % tb == 0, "batch must be divisible by the batch tile"
    assert C % tc == 0, "classes must be divisible by the class tile"

    target2d = target.astype(jnp.int32).reshape(B, 1)

    kernel = functools.partial(
        _label_smoothing_kernel,
        smoothing=float(smoothing),
        confidence=float(confidence),
        classes=int(classes),
        class_tile=int(tc),
    )

    # Explicit VMEM budget: double-buffered pred chunk + lane-padded (tb, 1)
    # target/output blocks + three (tb, 1) scratch accumulators + slack.
    pred_block_bytes = tb * tc * itemsize
    aux_bytes = 8 * tb * 128 * 4
    vmem_limit = int(min(max(2 * pred_block_bytes + aux_bytes + (4 << 20), 16 << 20),
                         limit_cap))

    row_loss = pl.pallas_call(
        kernel,
        out_shape=jax.ShapeDtypeStruct((B, 1), jnp.float32),
        grid_spec=pltpu.PrefetchScalarGridSpec(
            num_scalar_prefetch=0,
            grid=(B // tb, C // tc),
            in_specs=[
                pl.BlockSpec((tb, tc), lambda i, k: (i, k)),   # streamed pred chunk
                pl.BlockSpec((tb, 1), lambda i, k: (i, 0)),    # matching target tile
            ],
            out_specs=pl.BlockSpec((tb, 1), lambda i, k: (i, 0)),
            scratch_shapes=[pltpu.VMEM((tb, 1), jnp.float32)] * 3,  # m, d, s
        ),
        compiler_params=pltpu.CompilerParams(
            # Batch tiles are independent ("parallel" -> v7x megacore can shard
            # them); the class axis is a reduction ("arbitrary", last).
            dimension_semantics=("parallel", "arbitrary"),
            vmem_limit_bytes=vmem_limit,
        ),
    )(pred, target2d)

    # Final mean over the tiny (B, 1) per-row-loss vector in XLA.
    return jnp.mean(row_loss)


def _reference(pred, target, classes, smoothing):
    confidence = 1.0 - smoothing
    logp = jax.nn.log_softmax(pred.astype(jnp.float32), axis=-1)
    true_dist = jnp.full_like(logp, smoothing / (classes - 1))
    true_dist = true_dist.at[jnp.arange(pred.shape[0]), target].set(confidence)
    return jnp.mean(jnp.sum(-true_dist * logp, axis=-1))


if __name__ == "__main__":
    B, C = 16, 256
    smoothing = 0.1

    key = jax.random.PRNGKey(0)
    k_pred, k_tgt = jax.random.split(key)
    pred = jax.random.normal(k_pred, (B, C), dtype=jnp.float32)
    target = jax.random.randint(k_tgt, (B,), 0, C, dtype=jnp.int32)

    loss = label_smoothing_loss(pred, target, classes=C, smoothing=smoothing)
    loss = jax.block_until_ready(loss)

    ref = _reference(pred, target, C, smoothing)
    assert jnp.allclose(loss, ref, rtol=1e-5, atol=1e-5), (loss, ref)

    print("KERNEL_OK")
</pallas_src>

<mosaic_0001>
module attributes {stable_mosaic.version = 11 : i64} {
  func.func @_label_smoothing_kernel(%arg0: i32, %arg1: i32, %arg2: memref<16x256xf32, #tpu.memory_space<vmem>>, %arg3: memref<16x1xi32, #tpu.memory_space<vmem>>, %arg4: memref<16x1xf32, #tpu.memory_space<vmem>>, %arg5: memref<16x1xf32, #tpu.memory_space<vmem>>, %arg6: memref<16x1xf32, #tpu.memory_space<vmem>>, %arg7: memref<16x1xf32, #tpu.memory_space<vmem>>) attributes {dimension_semantics = [#tpu.dimension_semantics<parallel>, #tpu.dimension_semantics<arbitrary>], iteration_bounds = array<i64: 1, 1>, scalar_prefetch = 0 : i64, scratch_operands = 3 : i64, tpu.core_type = #tpu.core_type<tc>, window_params = [{transform_indices = @transform_0, window_bounds = array<i64: 16, 256>}, {transform_indices = @transform_1, window_bounds = array<i64: 16, 1>}, {transform_indices = @transform_2, window_bounds = array<i64: 16, 1>}]} {
    %c0_i32 = arith.constant 0 : i32
    %0 = arith.cmpi eq, %arg1, %c0_i32 : i32
    %1 = arith.extui %0 : i1 to i32
    %c0_i32_0 = arith.constant 0 : i32
    %2 = arith.cmpi ne, %1, %c0_i32_0 : i32
    scf.if %2 {
      %cst_22 = arith.constant 0xFF800000 : f32
      %40 = vector.broadcast %cst_22 : f32 to vector<16x1xf32>
      %c0_23 = arith.constant 0 : index
      %c0_24 = arith.constant 0 : index
      %41 = vector.load %arg5[%c0_23, %c0_24] : memref<16x1xf32, #tpu.memory_space<vmem>>, vector<16x1xf32>
      tpu.vector_store %arg5[%c0_23, %c0_24], %40 {strides = array<i32>} : memref<16x1xf32, #tpu.memory_space<vmem>>, vector<16x1xf32>,
      %cst_25 = arith.constant 0.000000e+00 : f32
      %42 = vector.broadcast %cst_25 : f32 to vector<16x1xf32>
      %c0_26 = arith.constant 0 : index
      %c0_27 = arith.constant 0 : index
      %43 = vector.load %arg6[%c0_26, %c0_27] : memref<16x1xf32, #tpu.memory_space<vmem>>, vector<16x1xf32>
      tpu.vector_store %arg6[%c0_26, %c0_27], %42 {strides = array<i32>} : memref<16x1xf32, #tpu.memory_space<vmem>>, vector<16x1xf32>,
      %cst_28 = arith.constant 0.000000e+00 : f32
      %44 = vector.broadcast %cst_28 : f32 to vector<16x1xf32>
      %c0_29 = arith.constant 0 : index
      %c0_30 = arith.constant 0 : index
      %45 = vector.load %arg7[%c0_29, %c0_30] : memref<16x1xf32, #tpu.memory_space<vmem>>, vector<16x1xf32>
      tpu.vector_store %arg7[%c0_29, %c0_30], %44 {strides = array<i32>} : memref<16x1xf32, #tpu.memory_space<vmem>>, vector<16x1xf32>,
    } else {
    }
    %c0 = arith.constant 0 : index
    %c0_1 = arith.constant 0 : index
    %3 = vector.load %arg2[%c0, %c0_1] : memref<16x256xf32, #tpu.memory_space<vmem>>, vector<16x256xf32>
    %c0_2 = arith.constant 0 : index
    %c0_3 = arith.constant 0 : index
    %4 = vector.load %arg3[%c0_2, %c0_3] : memref<16x1xi32, #tpu.memory_space<vmem>>, vector<16x1xi32>
    %c0_4 = arith.constant 0 : index
    %c0_5 = arith.constant 0 : index
    %5 = vector.load %arg5[%c0_4, %c0_5] : memref<16x1xf32, #tpu.memory_space<vmem>>, vector<16x1xf32>
    %cst = arith.constant dense<0xFF800000> : vector<16xf32>
    %6 = vector.multi_reduction <maximumf>, %3, %cst [1] : vector<16x256xf32> to vector<16xf32>
    %7 = vector.shape_cast %6 : vector<16xf32> to vector<16x1xf32>
    %8 = arith.maximumf %5, %7 : vector<16x1xf32>
    %c0_6 = arith.constant 0 : index
    %c0_7 = arith.constant 0 : index
    %9 = vector.load %arg6[%c0_6, %c0_7] : memref<16x1xf32, #tpu.memory_space<vmem>>, vector<16x1xf32>
    %10 = arith.subf %5, %8 : vector<16x1xf32>
    %11 = math.exp %10 : vector<16x1xf32>
    %12 = arith.mulf %9, %11 : vector<16x1xf32>
    %13 = vector.broadcast %8 : vector<16x1xf32> to vector<16x256xf32>
    %14 = arith.subf %3, %13 : vector<16x256xf32>
    %15 = math.exp %14 : vector<16x256xf32>
    %cst_8 = arith.constant dense<0.000000e+00> : vector<16xf32>
    %16 = vector.multi_reduction <add>, %15, %cst_8 [1] : vector<16x256xf32> to vector<16xf32>
    %17 = vector.shape_cast %16 : vector<16xf32> to vector<16x1xf32>
    %18 = arith.addf %12, %17 : vector<16x1xf32>
    %c0_9 = arith.constant 0 : index
    %c0_10 = arith.constant 0 : index
    %19 = vector.load %arg6[%c0_9, %c0_10] : memref<16x1xf32, #tpu.memory_space<vmem>>, vector<16x1xf32>
    tpu.vector_store %arg6[%c0_9, %c0_10], %18 {strides = array<i32>} : memref<16x1xf32, #tpu.memory_space<vmem>>, vector<16x1xf32>,
    %c0_11 = arith.constant 0 : index
    %c0_12 = arith.constant 0 : index
    %20 = vector.load %arg5[%c0_11, %c0_12] : memref<16x1xf32, #tpu.memory_space<vmem>>, vector<16x1xf32>
    tpu.vector_store %arg5[%c0_11, %c0_12], %8 {strides = array<i32>} : memref<16x1xf32, #tpu.memory_space<vmem>>, vector<16x1xf32>,
    %21 = tpu.iota {dimensions = array<i32: 1>} : vector<1x256xi32>
    %c256_i32 = arith.constant 256 : i32
    %22 = arith.muli %arg1, %c256_i32 : i32
    %23 = vector.broadcast %22 : i32 to vector<1x256xi32>
    %24 = arith.addi %21, %23 : vector<1x256xi32>
    %25 = vector.broadcast %24 : vector<1x256xi32> to vector<16x256xi32>
    %26 = vector.broadcast %4 : vector<16x1xi32> to vector<16x256xi32>
    %27 = arith.cmpi eq, %25, %26 : vector<16x256xi32>
    %cst_13 = arith.constant 0.899999976 : f32
    %cst_14 = arith.constant 3.92156857E-4 : f32
    %28 = vector.broadcast %cst_13 : f32 to vector<16x256xf32>
    %29 = vector.broadcast %cst_14 : f32 to vector<16x256xf32>
    %30 = arith.select %27, %28, %29 : vector<16x256xi1>, vector<16x256xf32>
    %c0_15 = arith.constant 0 : index
    %c0_16 = arith.constant 0 : index
    %31 = vector.load %arg7[%c0_15, %c0_16] : memref<16x1xf32, #tpu.memory_space<vmem>>, vector<16x1xf32>
    %32 = arith.mulf %3, %30 : vector<16x256xf32>
    %cst_17 = arith.constant dense<0.000000e+00> : vector<16xf32>
    %33 = vector.multi_reduction <add>, %32, %cst_17 [1] : vector<16x256xf32> to vector<16xf32>
    %34 = vector.shape_cast %33 : vector<16xf32> to vector<16x1xf32>
    %35 = arith.addf %31, %34 : vector<16x1xf32>
    %c0_18 = arith.constant 0 : index
    %c0_19 = arith.constant 0 : index
    %36 = vector.load %arg7[%c0_18, %c0_19] : memref<16x1xf32, #tpu.memory_space<vmem>>, vector<16x1xf32>
    tpu.vector_store %arg7[%c0_18, %c0_19], %35 {strides = array<i32>} : memref<16x1xf32, #tpu.memory_space<vmem>>, vector<16x1xf32>,
    %c0_i32_20 = arith.constant 0 : i32
    %37 = arith.cmpi eq, %arg1, %c0_i32_20 : i32
    %38 = arith.extui %37 : i1 to i32
    %c0_i32_21 = arith.constant 0 : i32
    %39 = arith.cmpi ne, %38, %c0_i32_21 : i32
    scf.if %39 {
      %c0_22 = arith.constant 0 : index
      %c0_23 = arith.constant 0 : index
      %40 = vector.load %arg5[%c0_22, %c0_23] : memref<16x1xf32, #tpu.memory_space<vmem>>, vector<16x1xf32>
      %c0_24 = arith.constant 0 : index
      %c0_25 = arith.constant 0 : index
      %41 = vector.load %arg6[%c0_24, %c0_25] : memref<16x1xf32, #tpu.memory_space<vmem>>, vector<16x1xf32>
      %42 = math.log %41 : vector<16x1xf32>
      %43 = arith.addf %40, %42 : vector<16x1xf32>
      %c0_26 = arith.constant 0 : index
      %c0_27 = arith.constant 0 : index
      %44 = vector.load %arg7[%c0_26, %c0_27] : memref<16x1xf32, #tpu.memory_space<vmem>>, vector<16x1xf32>
      %45 = arith.subf %43, %44 : vector<16x1xf32>
      %c0_28 = arith.constant 0 : index
      %c0_29 = arith.constant 0 : index
      %46 = vector.load %arg4[%c0_28, %c0_29] : memref<16x1xf32, #tpu.memory_space<vmem>>, vector<16x1xf32>
      tpu.vector_store %arg4[%c0_28, %c0_29], %45 {strides = array<i32>} : memref<16x1xf32, #tpu.memory_space<vmem>>, vector<16x1xf32>,
    } else {
    }
    return
  }
  func.func @transform_0(%arg0: i32, %arg1: i32) -> (i32, i32) {
    %c0_i32 = arith.constant 0 : i32
    return %arg0, %arg1 : i32, i32
  }
  func.func @transform_1(%arg0: i32, %arg1: i32) -> (i32, i32) {
    %c0_i32 = arith.constant 0 : i32
    %c0_i32_0 = arith.constant 0 : i32
    return %arg0, %c0_i32 : i32, i32
  }
  func.func @transform_2(%arg0: i32, %arg1: i32) -> (i32, i32) {
    %c0_i32 = arith.constant 0 : i32
    %c0_i32_0 = arith.constant 0 : i32
    return %arg0, %c0_i32 : i32, i32
  }
}

</mosaic_0001>

<bundles_post_ra>
// kernel: tpu_custom_call.1
= control target key start
LH: loop header
LB: loop body
LE: loop exit
PB: predicated region body
PF: predicated region fallthrough
CT: control target
= control target key end

     0   :  { %7 = vsyncpa [#allocation6], 0  ;;  %s212_s12 = smov [#allocation5]   ;;  %s213_s14 = smov 256   ;;  %s273_s0 = inlined_call_operand.hbm [shape: f32[16,256], index: 0, kind: input, shape index: {}]   ;;  %s274_s1 = inlined_call_operand.vmem [shape: s32[16,1], index: 1, kind: input, shape index: {}]   ;;  %s275_s2 = inlined_call_operand.vmem [shape: f32[16,1], index: 2, kind: output, shape index: {}]  }
   0x1   :  { %s12_s11 = sshll.u32 %s273_s0, 4  ;;  %s14_s13 = sshll.u32 %s212_s12, 4  ;;  %s13_s11 = int_to_ptr.hbm [resolvable:$true] %s12_s11  ;;  %s15_s13 = int_to_ptr.vmem [resolvable:$true] %s14_s13 }
   0x2   :  { %s214_s15 = smov 16  }
   0x3   :  { %20 = dma.hbm_to_vmem [thread:$0]  %s13_s11, 512, %s15_s13, [#allocation6], %s213_s14, %s213_s14, %s214_s15  }
   0x4   :  { %210 = dma.done.wait [#allocation6], 512  }
   0x5   :  { %211 = vsyncadd [#allocation6], 4294966784  ;;  %vm31_vm0 = vcmask 7168   ;;  %v215_v0 = vmov -inf   ;;  %v38_v1 = vld [vmem:[#allocation5] sm:$0xff]  ;;  %v39_v2 = vld [vmem:[#allocation5 + $0x8] sm:$0xff]  ;;  %v99_v19 = vlaneseq }
   0x6   :  { %32 = vst.msk [vmem:[#allocation2] sm:$0xff] %vm31_vm0, %v215_v0  ;;  %v46_v3 = vmax.f32 %v38_v1, %v39_v2  ;;  %v239_v4 = vld [vmem:[#allocation5 + $0x10] sm:$0xff]  ;;  %v241_v5 = vld [vmem:[#allocation5 + $0x18] sm:$0xff]  ;;  %v216_v7 = vmov 0   ;;  %v217_v8 = vmov 0.0  }
   0x7   :  { %33 = vst.msk [vmem:[#allocation2 + $0x8] sm:$0xff] %vm31_vm0, %v215_v0  ;;  %v49_v6 = vmax.f32 %v239_v4, %v241_v5  ;;  %167 = vset.pattern.permute.xlu1 %v216_v7  ;;  %168 = vset.pattern.permute.xlu2 %v216_v7  ;;  %v42_v9 = vld [vmem:[%s274_s1] sm:$0xff]  ;;  %v43_v10 = vld [vmem:[%s274_s1 + $0x8] sm:$0xff]  ;;  %v100_v20 = vand.u32 127, %v99_v19  ;;  %v218_v23 = vmov 0.00039215686  }
   0x8   :  { %47 = vmax.xlane.f32.xlu0 %v46_v3  ;;  %34 = vst.msk [vmem:[#allocation3] sm:$0xff] %vm31_vm0, %v217_v8  ;;  %107 = vperm.xlu2 %168, %v42_v9  }
   0x9   :  { %169 = vset.pattern.permute.xlu0 %v216_v7  ;;  %35 = vst.msk [vmem:[#allocation3 + $0x8] sm:$0xff] %vm31_vm0, %v217_v8  ;;  %v101_v22 = vadd.s32 128, %v100_v20 }
   0xa   :  { %36 = vst.msk [vmem:[#allocation4] sm:$0xff] %vm31_vm0, %v217_v8 }
   0xb   :  { %37 = vst.msk [vmem:[#allocation4 + $0x8] sm:$0xff] %vm31_vm0, %v217_v8 }
   0xd   :  { %v44_v11 = vld [vmem:[#allocation2] sm:$0xff] }
   0xe   :  { %v45_v15 = vld [vmem:[#allocation2 + $0x8] sm:$0xff] }
   0xf   :  { %v54_v57 = vld [vmem:[#allocation3] sm:$0xff] }
  0x10   :  { %50 = vmax.xlane.f32.xlu0 %v49_v6  ;;  %110 = vperm.xlu2 %168, %v43_v10   ;;  %v55_v62 = vld [vmem:[#allocation3 + $0x8] sm:$0xff] }
  0x11   :  { %v120_v52 = vld [vmem:[#allocation4] sm:$0xff] }
  0x12   :  { %v121_v63 = vld [vmem:[#allocation4 + $0x8] sm:$0xff] }
  0x62   :  { %v108_v21 = vpop.permute.xlu2 %107 }
  0x63   :  { %vm112_vm1 = vcmp.eq.s32.totalorder %v100_v20, %v108_v21  ;;  %vm113_vm2 = vcmp.eq.s32.totalorder %v101_v22, %v108_v21 }
  0x64   :  { %v116_v24 = vsel %vm112_vm1, 0.9, %v218_v23  ;;  %v117_v25 = vsel %vm113_vm2, 0.9, %v218_v23 }
  0x65   :  { %v122_v26 = vmul.f32 %v116_v24, %v38_v1  ;;  %v123_v27 = vmul.f32 %v117_v25, %v39_v2 }
  0x67   :  { %v126_v28 = vadd.f32 %v123_v27, %v122_v26 }
  0x69   :  { %127 = vadd.xlane.f32.xlu2 %v126_v28 }
  0x6a   :  { %v111_v34 = vpop.permute.xlu2 %110 }
  0x6b   :  { %vm114_vm3 = vcmp.eq.s32.totalorder %v100_v20, %v111_v34  ;;  %vm115_vm4 = vcmp.eq.s32.totalorder %v101_v22, %v111_v34 }
  0x6c   :  { %v118_v42 = vsel %vm114_vm3, 0.9, %v218_v23  ;;  %v119_v43 = vsel %vm115_vm4, 0.9, %v218_v23 }
  0x6d   :  { %v124_v45 = vmul.f32 %v118_v42, %v239_v4  ;;  %v125_v46 = vmul.f32 %v119_v43, %v241_v5 }
  0x6f   :  { %v129_v48 = vadd.f32 %v125_v46, %v124_v45 }
  0x7b   :  { %v48_v12 = vpop.xlane.xlu0 %47 }
  0x7c   :  { %v52_v13 = vmax.f32 %v44_v11, %v48_v12 }
  0x7e   :  { %v56_v14 = vsub.f32 %v44_v11, %v52_v13  ;;  %97 = vst.msk [vmem:[#allocation2] sm:$0xff] %vm31_vm0, %v52_v13  ;;  %66 = vperm.xlu1 %167, %v52_v13  }
  0x80   :  { %v58_v54 = vmul.f32 1.442695, %v56_v14 }
  0x83   :  { %v51_v16 = vpop.xlane.xlu0 %50 }
  0x84   :  { %v53_v17 = vmax.f32 %v45_v15, %v51_v16 }
  0x85   :  { %v139_v9 = vld [vmem:[#allocation2] sm:$0xff] }
  0x86   :  { %v57_v18 = vsub.f32 %v45_v15, %v53_v17  ;;  %98 = vst.msk [vmem:[#allocation2 + $0x8] sm:$0xff] %vm31_vm0, %v53_v17  ;;  %71 = vperm.xlu1 %167, %v53_v17  }
  0x88   :  { %v60_v55 = vmul.f32 1.442695, %v57_v18 }
  0x8d   :  { %v140_v15 = vld [vmem:[#allocation2 + $0x8] sm:$0xff] }
  0xdc   :  { %v128_v51 = vpop.xlane.xlu2 %127 }
  0xdd   :  { %v132_v53 = vadd.f32 %v128_v51, %v120_v52 }
  0xdf   :  { %134 = vst.msk [vmem:[#allocation4] sm:$0xff] %vm31_vm0, %v132_v53 }
  0xe6   :  { %v149_v10 = vld [vmem:[#allocation4] sm:$0xff] }
  0xf0   :  { %v67_v29 = vpop.permute.xlu1 %66 }
  0xf1   :  { %v74_v30 = vsub.f32 %v38_v1, %v67_v29  ;;  %v75_v31 = vsub.f32 %v39_v2, %v67_v29 }
  0xf3   :  { %v78_v32 = vmul.f32 1.442695, %v74_v30  ;;  %v80_v33 = vmul.f32 1.442695, %v75_v31 }
  0xf5   :  { %170 = vpow2.f32 %v78_v32 }
  0xf6   :  { %172 = vpow2.f32 %v80_v33 }
  0xf8   :  { %v72_v35 = vpop.permute.xlu1 %71 }
  0xf9   :  { %v76_v36 = vsub.f32 %v239_v4, %v72_v35  ;;  %v77_v37 = vsub.f32 %v241_v5, %v72_v35 }
  0xfb   :  { %v171_v38 = vpop.eup %170  ;;  %v82_v39 = vmul.f32 1.442695, %v76_v36  ;;  %v84_v40 = vmul.f32 1.442695, %v77_v37 }
  0xfc   :  { %v173_v41 = vpop.eup %172 }
  0xfd   :  { %174 = vpow2.f32 %v82_v39  ;;  %v86_v44 = vadd.f32 %v173_v41, %v171_v38 }
  0xfe   :  { %176 = vpow2.f32 %v84_v40 }
  0xff   :  { %87 = vadd.xlane.f32.xlu0 %v86_v44  ;;  %178 = vpow2.f32 %v58_v54 }
 0x100   :  { %180 = vpow2.f32 %v60_v55 }
 0x103   :  { %v175_v47 = vpop.eup %174 }
 0x104   :  { %v177_v49 = vpop.eup %176 }
 0x105   :  { %v89_v50 = vadd.f32 %v177_v49, %v175_v47  ;;  %v179_v56 = vpop.eup %178 }
 0x106   :  { %v62_v58 = vmul.f32 %v179_v56, %v54_v57  ;;  %v181_v61 = vpop.eup %180 }
 0x107   :  { %90 = vadd.xlane.f32.xlu1 %v89_v50  ;;  %130 = vadd.xlane.f32.xlu0 %v129_v48  ;;  %v63_v0 = vmul.f32 %v181_v61, %v55_v62 }
 0x172   :  { %v88_v59 = vpop.xlane.xlu0 %87 }
 0x173   :  { %v92_v60 = vadd.f32 %v88_v59, %v62_v58 }
 0x175   :  { %95 = vst.msk [vmem:[#allocation3] sm:$0xff] %vm31_vm0, %v92_v60 }
 0x17a   :  { %v91_v1 = vpop.xlane.xlu1 %90  ;;  %v131_v2 = vpop.xlane.xlu0 %130 }
 0x17b   :  { %v93_v3 = vadd.f32 %v91_v1, %v63_v0  ;;  %v133_v4 = vadd.f32 %v131_v2, %v121_v63 }
 0x17c   :  { %v141_v5 = vld [vmem:[#allocation3] sm:$0xff] }
 0x17d   :  { %182 = vlog2.f32 %v141_v5  ;;  %96 = vst.msk [vmem:[#allocation3 + $0x8] sm:$0xff] %vm31_vm0, %v93_v3 }
 0x17e   :  { %135 = vst.msk [vmem:[#allocation4 + $0x8] sm:$0xff] %vm31_vm0, %v133_v4 }
 0x183   :  { %v183_v6 = vpop.eup %182 }
 0x184   :  { %v144_v7 = vmul.f32 0.6931472, %v183_v6  ;;  %v142_v8 = vld [vmem:[#allocation3 + $0x8] sm:$0xff] }
 0x185   :  { %184 = vlog2.f32 %v142_v8  ;;  %v150_v17 = vld [vmem:[#allocation4 + $0x8] sm:$0xff] }
 0x186   :  { %v147_v11 = vadd.f32 %v144_v7, %v139_v9 }
 0x188   :  { %v151_v12 = vsub.f32 %v147_v11, %v149_v10 }
 0x18a   :  { %153 = vst.msk [vmem:[%s275_s2] sm:$0xff] %vm31_vm0, %v151_v12 }
 0x18b   :  { %v185_v13 = vpop.eup %184 }
 0x18c   :  { %v146_v14 = vmul.f32 0.6931472, %v185_v13 }
 0x18e   :  { %v148_v16 = vadd.f32 %v146_v14, %v140_v15 }
 0x190   :  { %v152_v18 = vsub.f32 %v148_v16, %v150_v17 }
 0x192   :  { %154 = vst.msk [vmem:[%s275_s2 + $0x8] sm:$0xff] %vm31_vm0, %v152_v18 }
 0x193   :  { %159 = vsyncpa [#allocation6], 1 }

</bundles_post_ra>
